<compile_context>
chip_gen: v6e
topology: v6e:2x2x1
jax: 0.10.0
libtpu: 0.0.40
codegen_flags: <defaults>
</compile_context>

<pallas_src>
import functools
import math

import jax
import jax.numpy as jnp
import numpy as np
from jax.experimental import pallas as pl
from jax.experimental.pallas import tpu as pltpu


def _prompt_embed_kernel(points_ref, labels_ref, coeffs_ref, deltas_ref,
                         pad_row_ref, out_ref, *, n_real, pad, batch, dim):
    """Single program over the whole (B, Np, D) slab.

    points_ref : (B, N, 2)  f32   raw pixel coords (no +0.5, no padding)
    labels_ref : (B, N, 1)  i32   {0,1,2} point classes
    coeffs_ref : (3, 1, D)  f32   [x-coeff, y-coeff, bias] with +0.5 / normalize
                                  / 2*pi / sin-vs-cos phase all folded in
    deltas_ref : (3, 1, D)  f32   signed combos of the 3 learned embeddings
    pad_row_ref: (1, 1, D)  f32   precomputed embedding of the padding point
    out_ref    : (B, Np, D) f32   Np = N + 1 if pad else N
    """
    pts = points_ref[...]                       # (B, N, 2)
    px = pts[:, :, 0:1]                         # (B, N, 1)
    py = pts[:, :, 1:2]                         # (B, N, 1)

    # Fully folded positional-encoding argument over the full lane width D:
    #   pe[..., j] = 2*pi*( (2*(x+0.5)/W - 1) * g[0, j mod D/2]
    #                     + (2*(y+0.5)/H - 1) * g[1, j mod D/2] ) + phase[j]
    # phase = 0 on the first half, pi/2 on the second half, so one jnp.sin
    # produces [sin(pe) | cos(pe)] -> one lane-dense, unmasked store per row.
    pe = px * coeffs_ref[0:1] + py * coeffs_ref[1:2] + coeffs_ref[2:3]  # (B,N,D)

    # Disjoint int32 label masks select the signed embedding combination.
    # (VALU work here is free filler: the EUP sin + the output store dominate.)
    lab = labels_ref[...]                       # (B, N, 1) int32
    delta = ((lab == 0).astype(jnp.float32) * deltas_ref[0:1]
             + (lab == 1).astype(jnp.float32) * deltas_ref[1:2]
             + (lab == 2).astype(jnp.float32) * deltas_ref[2:3])        # (B,N,D)

    out_ref[:, :n_real, :] = jnp.sin(pe) + delta

    if pad:  # static Python bool; pad row is a parameter-only constant
        out_ref[:, n_real:, :] = jnp.broadcast_to(pad_row_ref[...],
                                                  (batch, 1, dim))


def prepare_prompt_embedder_params(gauss, embs, input_image_size):
    """One-time parameter prep (init time) — hoisted out of the per-call path.

    gauss : (2, D//2) f32  pe_layer Gaussian projection matrix
    embs  : (3, D)    f32  the 3 learned point embeddings
    Returns (coeffs (3,1,D), deltas (3,1,D), pad_row (1,1,D)).
    """
    H, W = input_image_size  # static Python ints
    D = embs.shape[-1]
    half = D // 2

    g2pi = (2.0 * math.pi) * gauss.astype(jnp.float32)            # (2, half)
    g_full = jnp.concatenate([g2pi, g2pi], axis=1)                 # (2, D)
    phase = jnp.concatenate([jnp.zeros((half,), jnp.float32),
                             jnp.full((half,), 0.5 * math.pi, jnp.float32)])

    # pe = cx*g0 + cy*g1 + phase with cx = 2*(x+0.5)/W - 1 folded as
    # x*(2/W)*g0 + y*(2/H)*g1 + [(1/W-1)*g0 + (1/H-1)*g1 + phase].
    gx = g_full[0] * (2.0 / W)
    gy = g_full[1] * (2.0 / H)
    bias = g_full[0] * (1.0 / W - 1.0) + g_full[1] * (1.0 / H - 1.0) + phase
    coeffs = jnp.stack([gx, gy, bias], axis=0).reshape(3, 1, D)

    e0, e1, e2 = embs[0], embs[1], embs[2]
    deltas = jnp.stack([e0 - e1 - e2, e1 - e0 - e2, e2 - e0 - e1],
                       axis=0).astype(jnp.float32).reshape(3, 1, D)

    # Padding point is appended AFTER the +0.5 shift, so its raw coords are
    # exactly (0, 0) -> normalized (-1, -1); label -1 adds no learned delta.
    pad_row = jnp.sin(-g_full[0] - g_full[1] + phase).reshape(1, 1, D)

    return coeffs, deltas, pad_row


def prompt_embedder_forward(points, labels, pad, coeffs, deltas, pad_row):
    """Per-call path: reshape/cast + one pallas_call.  `pad` is static."""
    B, N, _ = points.shape
    D = coeffs.shape[-1]
    Np = N + 1 if pad else N

    points = points.astype(jnp.float32)
    labels3 = labels.astype(jnp.int32).reshape(B, N, 1)

    kernel = functools.partial(_prompt_embed_kernel,
                               n_real=N, pad=pad, batch=B, dim=D)

    vmem = pl.BlockSpec(memory_space=pltpu.MemorySpace.VMEM)
    cost = pl.CostEstimate(
        flops=10 * B * N * D,
        transcendentals=B * Np * D,
        bytes_accessed=B * N * (2 * 4 + 4) + B * Np * D * 4 + 7 * D * 4,
    )

    out = pl.pallas_call(
        kernel,
        out_shape=jax.ShapeDtypeStruct((B, Np, D), jnp.float32),
        in_specs=[vmem, vmem, vmem, vmem, vmem],
        out_specs=vmem,
        cost_estimate=cost,
    )(points, labels3, coeffs, deltas, pad_row)
    return out


def prompt_embedder_ref(points, labels, pad, gauss, embs, input_image_size):
    """Pure-JAX reference of the PyTorch forward (for verification)."""
    B = points.shape[0]
    points = points.astype(jnp.float32) + 0.5
    labels = labels.astype(jnp.float32)
    if pad:
        points = jnp.concatenate(
            [points, jnp.zeros((B, 1, 2), jnp.float32)], axis=1)
        labels = jnp.concatenate(
            [labels, -jnp.ones((B, 1), jnp.float32)], axis=1)
    H, W = input_image_size
    coords = points / jnp.array([W, H], jnp.float32)
    coords = 2.0 * coords - 1.0
    pe = coords @ gauss
    pe = 2.0 * math.pi * pe
    emb = jnp.concatenate([jnp.sin(pe), jnp.cos(pe)], axis=-1)
    e0, e1, e2 = embs[0], embs[1], embs[2]
    m0 = (labels == 0.0)[..., None]
    m1 = (labels == 1.0)[..., None]
    m2 = (labels == 2.0)[..., None]
    emb = emb + jnp.where(m0, e0 - e1 - e2, 0.0)
    emb = emb + jnp.where(m1, e1 - e0 - e2, 0.0)
    emb = emb + jnp.where(m2, e2 - e0 - e1, 0.0)
    return emb


if __name__ == "__main__":
    # Small deterministic setup.
    B, N, embed_dim = 2, 8, 32
    input_image_size = (16, 16)  # (H, W)

    key = jax.random.PRNGKey(0)
    k_pts, k_lab, k_gauss, k_e0, k_e1, k_e2 = jax.random.split(key, 6)

    points = jax.random.uniform(
        k_pts, (B, N, 2), jnp.float32, 0.0, float(input_image_size[1]))
    labels = jax.random.randint(k_lab, (B, N), 0, 3).astype(jnp.int32)

    # pe_layer: PositionEmbeddingRandom -> scale * randn(2, embed_dim // 2)
    gauss = jax.random.normal(k_gauss, (2, embed_dim // 2), jnp.float32)
    # nn.Embedding(1, embed_dim) x3 -> normal(0, 1) init, stacked to (3, D)
    embs = jnp.stack([
        jax.random.normal(k_e0, (embed_dim,), jnp.float32),
        jax.random.normal(k_e1, (embed_dim,), jnp.float32),
        jax.random.normal(k_e2, (embed_dim,), jnp.float32),
    ], axis=0)

    # Init-time parameter prep (done once, not per forward).
    coeffs, deltas, pad_row = prepare_prompt_embedder_params(
        gauss, embs, input_image_size)

    fwd = jax.jit(prompt_embedder_forward, static_argnums=(2,))
    out = fwd(points, labels, True, coeffs, deltas, pad_row)
    out = jax.block_until_ready(out)

    ref = prompt_embedder_ref(points, labels, True, gauss, embs,
                              input_image_size)
    np.testing.assert_allclose(np.asarray(out), np.asarray(ref),
                               rtol=1e-5, atol=1e-4)

    print("KERNEL_OK")
</pallas_src>

<mosaic_0001>
module attributes {stable_mosaic.version = 11 : i64} {
  func.func @_prompt_embed_kernel(%arg0: memref<2x8x2xf32, #tpu.memory_space<vmem>>, %arg1: memref<2x8x1xi32, #tpu.memory_space<vmem>>, %arg2: memref<3x1x32xf32, #tpu.memory_space<vmem>>, %arg3: memref<3x1x32xf32, #tpu.memory_space<vmem>>, %arg4: memref<1x1x32xf32, #tpu.memory_space<vmem>>, %arg5: memref<2x9x32xf32, #tpu.memory_space<vmem>>) attributes {dimension_semantics = [], scalar_prefetch = 0 : i64, scratch_operands = 0 : i64, tpu.core_type = #tpu.core_type<tc>} {
    %c0 = arith.constant 0 : index
    %c0_0 = arith.constant 0 : index
    %c0_1 = arith.constant 0 : index
    %0 = vector.load %arg0[%c0, %c0_0, %c0_1] : memref<2x8x2xf32, #tpu.memory_space<vmem>>, vector<2x8x2xf32>
    %1 = vector.extract_strided_slice %0 {offsets = [0, 0, 0], sizes = [2, 8, 1], strides = [1, 1, 1]} : vector<2x8x2xf32> to vector<2x8x1xf32>
    %2 = vector.extract_strided_slice %0 {offsets = [0, 0, 1], sizes = [2, 8, 1], strides = [1, 1, 1]} : vector<2x8x2xf32> to vector<2x8x1xf32>
    %c0_2 = arith.constant 0 : index
    %c0_3 = arith.constant 0 : index
    %c0_4 = arith.constant 0 : index
    %3 = vector.load %arg2[%c0_2, %c0_3, %c0_4] : memref<3x1x32xf32, #tpu.memory_space<vmem>>, vector<1x1x32xf32>
    %4 = vector.broadcast %1 : vector<2x8x1xf32> to vector<2x8x32xf32>
    %5 = vector.broadcast %3 : vector<1x1x32xf32> to vector<2x8x32xf32>
    %6 = arith.mulf %4, %5 : vector<2x8x32xf32>
    %c1 = arith.constant 1 : index
    %c0_5 = arith.constant 0 : index
    %c0_6 = arith.constant 0 : index
    %7 = vector.load %arg2[%c1, %c0_5, %c0_6] : memref<3x1x32xf32, #tpu.memory_space<vmem>>, vector<1x1x32xf32>
    %8 = vector.broadcast %2 : vector<2x8x1xf32> to vector<2x8x32xf32>
    %9 = vector.broadcast %7 : vector<1x1x32xf32> to vector<2x8x32xf32>
    %10 = arith.mulf %8, %9 : vector<2x8x32xf32>
    %11 = arith.addf %6, %10 : vector<2x8x32xf32>
    %c2 = arith.constant 2 : index
    %c0_7 = arith.constant 0 : index
    %c0_8 = arith.constant 0 : index
    %12 = vector.load %arg2[%c2, %c0_7, %c0_8] : memref<3x1x32xf32, #tpu.memory_space<vmem>>, vector<1x1x32xf32>
    %13 = vector.broadcast %12 : vector<1x1x32xf32> to vector<2x8x32xf32>
    %14 = arith.addf %11, %13 : vector<2x8x32xf32>
    %c0_9 = arith.constant 0 : index
    %c0_10 = arith.constant 0 : index
    %c0_11 = arith.constant 0 : index
    %15 = vector.load %arg1[%c0_9, %c0_10, %c0_11] : memref<2x8x1xi32, #tpu.memory_space<vmem>>, vector<2x8x1xi32>
    %c0_i32 = arith.constant 0 : i32
    %16 = vector.broadcast %c0_i32 : i32 to vector<2x8x1xi32>
    %17 = arith.cmpi eq, %15, %16 : vector<2x8x1xi32>
    %18 = arith.extui %17 : vector<2x8x1xi1> to vector<2x8x1xi32>
    %19 = arith.sitofp %18 : vector<2x8x1xi32> to vector<2x8x1xf32>
    %c0_12 = arith.constant 0 : index
    %c0_13 = arith.constant 0 : index
    %c0_14 = arith.constant 0 : index
    %20 = vector.load %arg3[%c0_12, %c0_13, %c0_14] : memref<3x1x32xf32, #tpu.memory_space<vmem>>, vector<1x1x32xf32>
    %21 = vector.broadcast %19 : vector<2x8x1xf32> to vector<2x8x32xf32>
    %22 = vector.broadcast %20 : vector<1x1x32xf32> to vector<2x8x32xf32>
    %23 = arith.mulf %21, %22 : vector<2x8x32xf32>
    %c1_i32 = arith.constant 1 : i32
    %24 = vector.broadcast %c1_i32 : i32 to vector<2x8x1xi32>
    %25 = arith.cmpi eq, %15, %24 : vector<2x8x1xi32>
    %26 = arith.extui %25 : vector<2x8x1xi1> to vector<2x8x1xi32>
    %27 = arith.sitofp %26 : vector<2x8x1xi32> to vector<2x8x1xf32>
    %c1_15 = arith.constant 1 : index
    %c0_16 = arith.constant 0 : index
    %c0_17 = arith.constant 0 : index
    %28 = vector.load %arg3[%c1_15, %c0_16, %c0_17] : memref<3x1x32xf32, #tpu.memory_space<vmem>>, vector<1x1x32xf32>
    %29 = vector.broadcast %27 : vector<2x8x1xf32> to vector<2x8x32xf32>
    %30 = vector.broadcast %28 : vector<1x1x32xf32> to vector<2x8x32xf32>
    %31 = arith.mulf %29, %30 : vector<2x8x32xf32>
    %32 = arith.addf %23, %31 : vector<2x8x32xf32>
    %c2_i32 = arith.constant 2 : i32
    %33 = vector.broadcast %c2_i32 : i32 to vector<2x8x1xi32>
    %34 = arith.cmpi eq, %15, %33 : vector<2x8x1xi32>
    %35 = arith.extui %34 : vector<2x8x1xi1> to vector<2x8x1xi32>
    %36 = arith.sitofp %35 : vector<2x8x1xi32> to vector<2x8x1xf32>
    %c2_18 = arith.constant 2 : index
    %c0_19 = arith.constant 0 : index
    %c0_20 = arith.constant 0 : index
    %37 = vector.load %arg3[%c2_18, %c0_19, %c0_20] : memref<3x1x32xf32, #tpu.memory_space<vmem>>, vector<1x1x32xf32>
    %38 = vector.broadcast %36 : vector<2x8x1xf32> to vector<2x8x32xf32>
    %39 = vector.broadcast %37 : vector<1x1x32xf32> to vector<2x8x32xf32>
    %40 = arith.mulf %38, %39 : vector<2x8x32xf32>
    %41 = arith.addf %32, %40 : vector<2x8x32xf32>
    %42 = math.sin %14 : vector<2x8x32xf32>
    %43 = arith.addf %42, %41 : vector<2x8x32xf32>
    %c0_21 = arith.constant 0 : index
    %c0_22 = arith.constant 0 : index
    %c0_23 = arith.constant 0 : index
    %44 = vector.load %arg5[%c0_21, %c0_22, %c0_23] : memref<2x9x32xf32, #tpu.memory_space<vmem>>, vector<2x8x32xf32>
    tpu.vector_store %arg5[%c0_21, %c0_22, %c0_23], %43 {strides = array<i32>} : memref<2x9x32xf32, #tpu.memory_space<vmem>>, vector<2x8x32xf32>,
    %c0_24 = arith.constant 0 : index
    %c0_25 = arith.constant 0 : index
    %c0_26 = arith.constant 0 : index
    %45 = vector.load %arg4[%c0_24, %c0_25, %c0_26] : memref<1x1x32xf32, #tpu.memory_space<vmem>>, vector<1x1x32xf32>
    %46 = vector.shape_cast %45 : vector<1x1x32xf32> to vector<1x1x32xf32>
    %47 = vector.broadcast %46 : vector<1x1x32xf32> to vector<2x1x32xf32>
    %c0_27 = arith.constant 0 : index
    %c8 = arith.constant 8 : index
    %c0_28 = arith.constant 0 : index
    %48 = vector.load %arg5[%c0_27, %c8, %c0_28] : memref<2x9x32xf32, #tpu.memory_space<vmem>>, vector<2x1x32xf32>
    tpu.vector_store %arg5[%c0_27, %c8, %c0_28], %47 {strides = array<i32>} : memref<2x9x32xf32, #tpu.memory_space<vmem>>, vector<2x1x32xf32>,
    return
  }
}

</mosaic_0001>

<bundles_post_ra>
// kernel: prompt_embedder_forward.1
= control target key start
LH: loop header
LB: loop body
LE: loop exit
PB: predicated region body
PF: predicated region fallthrough
CT: control target
= control target key end

     0   :  { %v442_v0 = vmov 1   ;;  %v443_v1 = vmov 0   ;;  %v444_v6 = vmov 0.0   ;;  %vm368_vm6 = vcmask 253952   ;;  %s609_s0 = inlined_call_operand.vmem [shape: f32[2,8,2], index: 0, kind: input, shape index: {}]   ;;  %s610_s1 = inlined_call_operand.vmem [shape: s32[2,8,1], index: 1, kind: input, shape index: {}]   ;;  %s611_s4 = inlined_call_operand.vmem [shape: f32[1,1,32], index: 4, kind: input, shape index: {}]   ;;  %s612_s5 = inlined_call_operand.vmem [shape: f32[2,9,32], index: 5, kind: output, shape index: {}]   ;;  %s613_s2 = inlined_call_operand.vmem [shape: f32[3,1,32], index: 2, kind: input, shape index: {}]   ;;  %s614_s3 = inlined_call_operand.vmem [shape: f32[3,1,32], index: 3, kind: input, shape index: {}]  }
   0x1   :  { %417 = vset.pattern.permute.xlu1 %v442_v0  ;;  %416 = vset.pattern.permute.xlu0 %v443_v1  ;;  %v20_v2 = vld [vmem:[%s609_s0] sm:$0xff]  ;;  %v72_v4 = vld [vmem:[%s610_s1 + $0x8] sm:$0xff]  ;;  %v445_v48 = vmov 683565275   ;;  %v446_v52 = vmov 2475754826  }
   0x2   :  { %v71_v3 = vld [vmem:[%s610_s1] sm:$0xff]  ;;  %44 = vperm.xlu1 %417, %v20_v2   ;;  %25 = vperm.xlu0 %416, %v20_v2   ;;  %v21_v5 = vld [vmem:[%s609_s0 + $0x8] sm:$0xff]  ;;  %vm74_vm2 = vcmp.eq.s32.totalorder %v72_v4, 0  ;;  %vm99_vm3 = vcmp.eq.s32.totalorder %v72_v4, 1  ;;  %vm127_vm5 = vcmp.eq.s32.totalorder %v72_v4, 2 }
   0x3   :  { %vm73_vm0 = vcmp.eq.s32.totalorder %v71_v3, 0  ;;  %vm98_vm1 = vcmp.eq.s32.totalorder %v71_v3, 1  ;;  %vm126_vm4 = vcmp.eq.s32.totalorder %v71_v3, 2  ;;  %v381_v8 = vsel %vm74_vm2, 1.0, %v444_v6  ;;  %v367_v16 = vld [vmem:[%s611_s4] sm:$0x1] }
   0x4   :  { %v380_v7 = vsel %vm73_vm0, 1.0, %v444_v6  ;;  %v383_v9 = vsel %vm98_vm1, 1.0, %v444_v6  ;;  %v384_v10 = vsel %vm99_vm3, 1.0, %v444_v6  ;;  %v387_v13 = vsel %vm126_vm4, 1.0, %v444_v6  ;;  %369 = vst.msk [vmem:[%s612_s5 + $0x8] sm:$0x1] %vm368_vm6, %v367_v16 }
   0x5   :  { %v418_v11 = vpack.i.bf16 %v381_v8, %v380_v7  ;;  %v424_v12 = vpack.i.bf16 %v384_v10, %v383_v9  ;;  %v388_v14 = vsel %vm127_vm5, 1.0, %v444_v6  ;;  %370 = vst.msk [vmem:[%s612_s5 + $0x18] sm:$0x1] %vm368_vm6, %v367_v16  ;;  %v377_v17 = vld [vmem:[%s613_s2 + $0x1] ss:$0 sm:$0xff] }
   0x6   :  { %48 = vperm.xlu1 %417, %v21_v5   ;;  %30 = vperm.xlu0 %416, %v21_v5   ;;  %v429_v15 = vpack.i.bf16 %v388_v14, %v387_v13  ;;  %v375_v18 = vld [vmem:[%s613_s2] ss:$0 sm:$0xff]  ;;  %v379_v23 = vld [vmem:[%s613_s2 + $0x2] ss:$0 sm:$0xff]  ;;  %v447_v54 = vmov 2131351028  }
   0x7   :  { %v448_v56 = vmov 2102212464   ;;  %v449_v58 = vmov 920167782  }
   0xa   :  { %423 = vset.pattern.permute.xlu1 %v443_v1  ;;  %419 = vperm.xlu0 %416, %v418_v11   ;;  %v450_v1 = vmov 1326507024  }
   0xb   :  { %425 = vperm.xlu1 %423, %v424_v12  }
   0xe   :  { %430 = vperm.xlu0 %416, %v429_v15  }
  0x7d   :  { %v45_v19 = vpop.permute.xlu1 %44  ;;  %v26_v20 = vpop.permute.xlu0 %25 }
  0x7e   :  { %v57_v21 = vmul.f32 %v377_v17, %v45_v19  ;;  %v39_v22 = vmul.f32 %v375_v18, %v26_v20 }
  0x80   :  { %v59_v24 = vadd.f32 %v57_v21, %v39_v22 }
  0x81   :  { %v49_v25 = vpop.permute.xlu1 %48  ;;  %v31_v26 = vpop.permute.xlu0 %30 }
  0x82   :  { %v511_v27 = vadd.f32 %v379_v23, %v59_v24  ;;  %v58_v28 = vmul.f32 %v377_v17, %v49_v25  ;;  %v40_v29 = vmul.f32 %v375_v18, %v31_v26 }
  0x84   :  { %v154_v30 = vand.u32 2147483647, %v511_v27  ;;  %v157_v31 = vand.u32 2139095040, %v511_v27  ;;  %v60_v32 = vadd.f32 %v58_v28, %v40_v29  ;;  %vm156_vm5 = vcmp.lt.s32.totalorder %v511_v27, 0 }
  0x86   :  { %v158_v33 = vshrl.u32 %v157_v31, 23  ;;  %v515_v34 = vadd.f32 %v379_v23, %v60_v32  ;;  %v161_v35 = vand.u32 8388607, %v154_v30  ;;  %vm567_vm6 = vcmp.le.f32.partialorder %v154_v30, 0.7853982 }
  0x88   :  { %v391_v36 = vadd.s32 4294967169, %v158_v33  ;;  %v261_v37 = vand.u32 2139095040, %v515_v34  ;;  %v162_v39 = vor.u32 8388608, %v161_v35  ;;  %v258_v41 = vand.u32 2147483647, %v515_v34 }
  0x8a   :  { %v164_v38 = vadd.s32 1, %v391_v36  ;;  %v262_v40 = vshrl.u32 %v261_v37, 23  ;;  %v521_v46 = vshll.u32 %v162_v39, 8  ;;  %v265_v50 = vand.u32 8388607, %v258_v41 }
  0x8c   :  { %vm165_vm7 = vcmp.gt.s32.totalorder %v164_v38, 0  ;;  %v395_v43 = vadd.s32 4294967169, %v262_v40  ;;  %v266_v16 = vor.u32 8388608, %v265_v50 }
  0x8d   :  { %v166_v42 = vsel %vm165_vm7, %v164_v38, 0  ;;  %vm260_vm7 = vcmp.lt.s32.totalorder %v515_v34, 0 }
  0x8e   :  { %v167_v44 = vshrl.u32 %v166_v42, 5  ;;  %v168_v45 = vand.u32 31, %v166_v42  ;;  %v268_v51 = vadd.s32 1, %v395_v43  ;;  %v306_v31 = vshll.u32 %v266_v16, 8 }
  0x90   :  { %v169_v47 = vsub.s32 32, %v168_v45  ;;  %v171_v49 = vshll.u32 %v445_v48, %v168_v45  ;;  %v174_v53 = vshll.u32 %v446_v52, %v168_v45  ;;  %v177_v55 = vshll.u32 %v447_v54, %v168_v45 }
  0x91   :  { %v180_v57 = vshll.u32 %v448_v56, %v168_v45  ;;  %v183_v59 = vshll.u32 %v449_v58, %v168_v45  ;;  %vm186_vm8 = vcmp.lt.s32.totalorder %v167_v44, 1  ;;  %vm188_vm9 = vcmp.lt.s32.totalorder %v167_v44, 3 }
  0x92   :  { %v172_v60 = vshrl.u32 %v446_v52, %v169_v47  ;;  %v175_v61 = vshrl.u32 %v447_v54, %v169_v47  ;;  %v178_v62 = vshrl.u32 %v448_v56, %v169_v47  ;;  %v170_v63 = vshrl.u32 %v445_v48, %v169_v47 }
  0x93   :  { %v181_v0 = vshrl.u32 %v449_v58, %v169_v47  ;;  %v184_v2 = vshrl.u32 %v450_v1, %v169_v47  ;;  %vm269_vm10 = vcmp.gt.s32.totalorder %v268_v51, 0  ;;  %vm189_vm11 = vcmp.lt.s32.totalorder %v167_v44, 4 }
  0x94   :  { %v173_v3 = vor.u32 %v172_v60, %v171_v49  ;;  %v176_v4 = vor.u32 %v175_v61, %v174_v53  ;;  %v179_v5 = vor.u32 %v178_v62, %v177_v55  ;;  %v270_v8 = vsel %vm269_vm10, %v268_v51, 0 }
  0x95   :  { %v182_v6 = vor.u32 %v181_v0, %v180_v57  ;;  %v185_v7 = vor.u32 %v184_v2, %v183_v59  ;;  %vm187_vm12 = vcmp.lt.s32.totalorder %v167_v44, 2  ;;  %v272_v19 = vand.u32 31, %v270_v8 }
  0x96   :  { %v190_v9 = vsel %vm186_vm8, %v170_v63, %v173_v3  ;;  %v191_v10 = vsel %vm189_vm11, %v179_v5, 2102212464  ;;  %v194_v11 = vsel %vm186_vm8, %v173_v3, %v176_v4  ;;  %v198_v12 = vsel %vm186_vm8, %v176_v4, %v179_v5 }
  0x97   :  { %v192_v13 = vsel %vm188_vm9, %v176_v4, %v191_v10  ;;  %v195_v14 = vsel %vm189_vm11, %v182_v6, 920167782  ;;  %v199_v15 = vsel %vm189_vm11, %v185_v7, 1326507024  ;;  %v271_v28 = vshrl.u32 %v270_v8, 5 }
  0x98   :  { %v196_v17 = vsel %vm188_vm9, %v179_v5, %v195_v14  ;;  %v200_v18 = vsel %vm188_vm9, %v182_v6, %v199_v15  ;;  %v193_v20 = vsel %vm187_vm12, %v190_v9, %v192_v13  ;;  %v273_v29 = vsub.s32 32, %v272_v19 }
  0x99   :  { %v197_v21 = vsel %vm187_vm12, %v194_v11, %v196_v17  ;;  %v201_v22 = vsel %vm187_vm12, %v198_v12, %v200_v18  ;;  %v209_v32 = vmul.u32 %v521_v46, %v193_v20  ;;  %v275_v33 = vshll.u32 %v445_v48, %v272_v19 }
  0x9a   :  { %v534_v23 = vmul.u32.u64.low %v521_v46, %v201_v22  ;;  %v535_v24 = vmul.u32.u64.high %v521_v46, %v201_v22, %v534_v23  ;;  %v538_v25 = vmul.u32.u64.low %v521_v46, %v197_v21  ;;  %v539_v26 = vmul.u32.u64.high %v521_v46, %v197_v21, %v538_v25 }
  0x9b   :  { %v278_v35 = vshll.u32 %v446_v52, %v272_v19  ;;  %v281_v36 = vshll.u32 %v447_v54, %v272_v19  ;;  %v276_v37 = vshrl.u32 %v446_v52, %v273_v29  ;;  %v279_v38 = vshrl.u32 %v447_v54, %v273_v29 }
  0x9c   :  { %v282_v39 = vshrl.u32 %v448_v56, %v273_v29  ;;  %v284_v40 = vshll.u32 %v448_v56, %v272_v19  ;;  %vm211_vm13 = vc.u32 %v535_v24, %v538_v25  ;;  %v212_v42 = vadd.s32 1, %v539_v26 }
  0x9d   :  { %v285_v43 = vshrl.u32 %v449_v58, %v273_v29  ;;  %v287_v44 = vshll.u32 %v449_v58, %v272_v19  ;;  %v277_v45 = vor.u32 %v276_v37, %v275_v33  ;;  %v280_v47 = vor.u32 %v279_v38, %v278_v35 }
  0x9e   :  { %v283_v49 = vor.u32 %v282_v39, %v281_v36  ;;  %v288_v50 = vshrl.u32 %v450_v1, %v273_v29  ;;  %v213_v46 = vsel %vm211_vm13, %v212_v42, %v539_v26  ;;  %vm290_vm14 = vcmp.lt.s32.totalorder %v271_v28, 1 }
  0x9f   :  { %v286_v51 = vor.u32 %v285_v43, %v284_v40  ;;  %vm293_vm15 = vcmp.lt.s32.totalorder %v271_v28, 4  ;;  %v214_v52 = vadd.s32 %v213_v46, %v209_v32  ;;  %vm292_vm0 = vcmp.lt.s32.totalorder %v271_v28, 3 }
  0xa0   :  { %v289_v53 = vor.u32 %v288_v50, %v287_v44  ;;  %v295_v54 = vsel %vm293_vm15, %v283_v49, 2102212464  ;;  %v274_v55 = vshrl.u32 %v445_v48, %v273_v29  ;;  %v298_v56 = vsel %vm290_vm14, %v277_v45, %v280_v47 }
  0xa1   :  { %v299_v57 = vsel %vm293_vm15, %v286_v51, 920167782  ;;  %v302_v59 = vsel %vm290_vm14, %v280_v47, %v283_v49  ;;  %v215_v60 = vadd.s32 536870912, %v214_v52  ;;  %vm291_vm1 = vcmp.lt.s32.totalorder %v271_v28, 2 }
  0xa2   :  { %v300_v58 = vsel %vm292_vm0, %v283_v49, %v299_v57  ;;  %v303_v61 = vsel %vm293_vm15, %v289_v53, 1326507024  ;;  %v294_v62 = vsel %vm290_vm14, %v274_v55, %v277_v45  ;;  %v296_v63 = vsel %vm292_vm0, %v280_v47, %v295_v54 }
  0xa3   :  { %v301_v0 = vsel %vm291_vm1, %v298_v56, %v300_v58  ;;  %v304_v1 = vsel %vm292_vm0, %v286_v51, %v303_v61  ;;  %v216_v2 = vshrl.u32 %v215_v60, 30  ;;  %v297_v8 = vsel %vm291_vm1, %v294_v62, %v296_v63  ;;  %v420_v60 = vpop.permute.xlu0 %419  ;;  %v426_v63 = vpop.permute.xlu1 %425 }
  0xa4   :  { %v305_v3 = vsel %vm291_vm1, %v302_v59, %v304_v1  ;;  %v549_v4 = vmul.u32.u64.low %v306_v31, %v301_v0  ;;  %v550_v5 = vmul.u32.u64.high %v306_v31, %v301_v0, %v549_v4  ;;  %v313_v11 = vmul.u32 %v306_v31, %v297_v8 }
  0xa5   :  { %v552_v6 = vmul.u32.u64.low %v306_v31, %v305_v3  ;;  %v553_v7 = vmul.u32.u64.high %v306_v31, %v305_v3, %v552_v6  ;;  %v217_v48 = vshll.u32 %v216_v2, 30  ;;  %v210_v23 = vadd.s32 %v538_v25, %v535_v24 }
  0xa6   :  { %v316_v10 = vadd.s32 1, %v550_v5  ;;  %v421_v1 = vunpack.i.l.bf16 %v420_v60  ;;  %v427_v3 = vunpack.i.l.bf16 %v426_v63  ;;  %v386_v6 = vld [vmem:[%s614_s3 + $0x1] ss:$0 sm:$0xff]  ;;  %vm586_vm8 = vcmp.le.f32.partialorder %v258_v41, 0.7853982 }
  0xa7   :  { %v218_v9 = vsub.s32 %v214_v52, %v217_v48  ;;  %vm315_vm2 = vc.u32 %v553_v7, %v549_v4  ;;  %v314_v47 = vadd.s32 %v549_v4, %v553_v7  ;;  %v240_v52 = vsub.s32 4, %v216_v2 }
  0xa8   :  { %v317_v13 = vsel %vm315_vm2, %v316_v10, %v550_v5  ;;  %v382_v5 = vld [vmem:[%s614_s3] ss:$0 sm:$0xff]  ;;  %vm246_vm12 = vweird.f32 %v511_v27  ;;  %vm364_vm13 = vcmask 261120   ;;  %vm350_vm1 = vweird.f32 %v515_v34 }
  0xa9   :  { %v220_v12 = vsub.s32 0, %v218_v9  ;;  %v318_v14 = vadd.s32 %v317_v13, %v313_v11  ;;  %v241_v58 = vsel %vm156_vm5, %v240_v52, %v216_v2  ;;  %v431_v2 = vpop.permute.xlu0 %430  ;;  %v96_v11 = vmul.f32 %v421_v1, %v382_v5 }
  0xaa   :  { %v243_v30 = vsel %vm567_vm6, 0, %v241_v58  ;;  %v432_v13 = vunpack.i.l.bf16 %v431_v2 }
  0xab   :  { %v392_v15 = vmin.u32 %v220_v12, %v218_v9  ;;  %v319_v16 = vadd.s32 536870912, %v318_v14  ;;  %v247_v7 = vadd.s32 3, %v243_v30  ;;  %v122_v12 = vmul.f32 %v427_v3, %v386_v6 }
  0xad   :  { %v222_v17 = vclz %v392_v15  ;;  %v558_v18 = vshrl.u32 %v319_v16, 30  ;;  %v248_v15 = vand.u32 3, %v247_v7 }
  0xaf   :  { %v393_v19 = vadd.s32 4294967294, %v222_v17  ;;  %v321_v20 = vshll.u32 %v558_v18, 30  ;;  %v344_v48 = vsub.s32 4, %v558_v18  ;;  %vm253_vm9 = vcmp.eq.s32.totalorder %v248_v15, 2 }
  0xb0   :  { %vm250_vm10 = vcmp.eq.s32.totalorder %v248_v15, 0  ;;  %vm249_vm11 = vcmp.lt.s32.totalorder %v248_v15, 2 }
  0xb1   :  { %vm394_vm3 = vcmp.lt.s32.totalorder %v393_v19, 0  ;;  %v322_v22 = vsub.s32 %v318_v14, %v321_v20  ;;  %v390_v14 = vld [vmem:[%s614_s3 + $0x2] ss:$0 sm:$0xff]  ;;  %v345_v41 = vsel %vm260_vm7, %v344_v48, %v558_v18 }
  0xb2   :  { %v225_v21 = vsel %vm394_vm3, 0, %v393_v19  ;;  %v124_v19 = vadd.f32 %v122_v12, %v96_v11 }
  0xb3   :  { %v226_v26 = vsub.s32 32, %v225_v21  ;;  %v230_v28 = vsub.s32 4294967266, %v225_v21  ;;  %v324_v29 = vsub.s32 0, %v322_v22  ;;  %v227_v31 = vshll.u32 %v218_v9, %v225_v21 }
  0xb4   :  { %v150_v21 = vmul.f32 %v432_v13, %v390_v14 }
  0xb5   :  { %v228_v32 = vshrl.u32 %v210_v23, %v226_v26  ;;  %v231_v33 = vadd.s32 127, %v230_v28  ;;  %v396_v35 = vmin.u32 %v324_v29, %v322_v22  ;;  %v347_v23 = vsel %vm586_vm8, 0, %v345_v41 }
  0xb6   :  { %v422_v28 = vunpack.i.h.bf16 %v420_v60  ;;  %v428_v29 = vunpack.i.h.bf16 %v426_v63  ;;  %v351_v18 = vadd.s32 3, %v347_v23 }
  0xb7   :  { %v229_v36 = vor.u32 %v228_v32, %v227_v31  ;;  %v232_v37 = vshll.u32 %v231_v33, 23  ;;  %v326_v38 = vclz %v396_v35  ;;  %v152_v33 = vadd.f32 %v150_v21, %v124_v19 }
  0xb9   :  { %v233_v39 = vor.u32 4788187, %v232_v37  ;;  %v397_v40 = vadd.s32 4294967294, %v326_v38  ;;  %v236_v43 = vcvt.s32.f32 %v229_v36  ;;  %v97_v37 = vmul.f32 %v422_v28, %v382_v5 }
  0xba   :  { %v123_v38 = vmul.f32 %v428_v29, %v386_v6 }
  0xbb   :  { %v234_v42 = vand.u32 2147483647, %v233_v39  ;;  %vm398_vm4 = vcmp.lt.s32.totalorder %v397_v40, 0  ;;  %v433_v39 = vunpack.i.h.bf16 %v431_v2 }
  0xbc   :  { %v329_v45 = vsel %vm398_vm4, 0, %v397_v40  ;;  %v352_v40 = vand.u32 3, %v351_v18 }
  0xbd   :  { %v237_v44 = vmul.f32 %v236_v43, %v234_v42  ;;  %v330_v24 = vsub.s32 32, %v329_v45  ;;  %v334_v25 = vsub.s32 4294967266, %v329_v45  ;;  %v331_v50 = vshll.u32 %v322_v22, %v329_v45 }
  0xbe   :  { %vm357_vm14 = vcmp.eq.s32.totalorder %v352_v40, 2  ;;  %vm354_vm15 = vcmp.eq.s32.totalorder %v352_v40, 0  ;;  %vm353_vm0 = vcmp.lt.s32.totalorder %v352_v40, 2 }
  0xbf   :  { %v238_v49 = vxor.u32 2147483648, %v237_v44  ;;  %v332_v46 = vshrl.u32 %v314_v47, %v330_v24  ;;  %v335_v51 = vadd.s32 127, %v334_v25 }
  0xc1   :  { %v239_v54 = vsel %vm156_vm5, %v238_v49, %v237_v44  ;;  %v333_v56 = vor.u32 %v332_v46, %v331_v50  ;;  %v336_v57 = vshll.u32 %v335_v51, 23  ;;  %v125_v44 = vadd.f32 %v123_v38, %v97_v37 }
  0xc2   :  { %v242_v55 = vsel %vm567_vm6, %v511_v27, %v239_v54  ;;  %v151_v27 = vmul.f32 %v433_v39, %v390_v14 }
  0xc3   :  { %434 = vcosq.f32 %v242_v55  ;;  %v337_v59 = vor.u32 4788187, %v336_v57  ;;  %v340_v62 = vcvt.s32.f32 %v333_v56 }
  0xc4   :  { %436 = vsinq.f32 %v242_v55  ;;  %v153_v50 = vadd.f32 %v151_v27, %v125_v44 }
  0xc5   :  { %v338_v61 = vand.u32 2147483647, %v337_v59 }
  0xc7   :  { %v341_v0 = vmul.f32 %v340_v62, %v338_v61 }
  0xc9   :  { %v342_v4 = vxor.u32 2147483648, %v341_v0 }
  0xcb   :  { %v343_v9 = vsel %vm260_vm7, %v342_v4, %v341_v0 }
  0xcc   :  { %v346_v10 = vsel %vm586_vm8, %v515_v34, %v343_v9 }
  0xcd   :  { %438 = vcosq.f32 %v346_v10 }
  0xce   :  { %440 = vsinq.f32 %v346_v10 }
  0xd0   :  { %v435_v16 = vpop.eup %434 }
  0xd1   :  { %v437_v17 = vpop.eup %436  ;;  %v254_v20 = vxor.u32 2147483648, %v435_v16 }
  0xd2   :  { %v251_v22 = vxor.u32 2147483648, %v437_v17 }
  0xd3   :  { %v255_v26 = vsel %vm253_vm9, %v254_v20, %v437_v17 }
  0xd4   :  { %v252_v31 = vsel %vm250_vm10, %v435_v16, %v251_v22 }
  0xd5   :  { %v256_v32 = vsel %vm249_vm11, %v252_v31, %v255_v26 }
  0xd6   :  { %v257_v35 = vsel %vm246_vm12, nan, %v256_v32 }
  0xd7   :  { %v362_v36 = vadd.f32 %v257_v35, %v152_v33 }
  0xd9   :  { %365 = vst.msk [vmem:[%s612_s5] sm:$0xff] %vm364_vm13, %v362_v36 }
  0xda   :  { %v439_v42 = vpop.eup %438 }
  0xdb   :  { %v441_v43 = vpop.eup %440  ;;  %v358_v45 = vxor.u32 2147483648, %v439_v42 }
  0xdc   :  { %v355_v47 = vxor.u32 2147483648, %v441_v43 }
  0xdd   :  { %v359_v24 = vsel %vm357_vm14, %v358_v45, %v441_v43 }
  0xde   :  { %v356_v25 = vsel %vm354_vm15, %v439_v42, %v355_v47 }
  0xdf   :  { %v360_v49 = vsel %vm353_vm0, %v356_v25, %v359_v24 }
  0xe0   :  { %v361_v46 = vsel %vm350_vm1, nan, %v360_v49 }
  0xe1   :  { %v363_v51 = vadd.f32 %v361_v46, %v153_v50 }
  0xe3   :  { %366 = vst.msk [vmem:[%s612_s5 + $0x10] sm:$0xff] %vm364_vm13, %v363_v51 }

</bundles_post_ra>
